<compile_context>
chip_gen: v6e
topology: v6e:2x2x1
jax: 0.10.0
libtpu: 0.0.40
codegen_flags: <defaults>
</compile_context>

<pallas_src>
import functools

import jax
import jax.numpy as jnp
from jax import lax
from jax.experimental import pallas as pl
from jax.experimental.pallas import tpu as pltpu

_NEG = -1e30  # finite "-inf" to avoid inf-inf NaNs in the online LSE


def _round_up(x, m):
    return (x + m - 1) // m * m


def _cdiv(a, b):
    return (a + b - 1) // b


def _vmem_capacity_bytes():
    try:
        return int(pltpu.get_tpu_info().vmem_capacity_bytes)
    except Exception:
        return 64 << 20  # conservative fallback (v7x per-TC VMEM)


def _ce_kernel(x_ref, w_ref, lbl_ref, loss_ref, m_ref, l_ref, t_ref, *,
               v_total, mask_tail):
    """One (vocab-tile j OUTER, token-tile i INNER) step of fused LM-head + CE.

    x_ref   : (TM, H)    hidden-state tile (tokens on sublanes, native layout)
    w_ref   : (TV, H)    lm_head weight tile (native [vocab, hidden] layout)
    lbl_ref : (1, TM)    int32 target ids for this token tile (lane-dense)
    loss_ref: (1, TM)    per-token NLL (written at the last vocab tile)
    m/l/t   : (n_i, TM)  running max / sum-of-exp / target logit, row i = token tile i
    """
    j = pl.program_id(0)          # vocab tile (outer, reduction axis of the LSE)
    i = pl.program_id(1)          # token tile (inner)
    tv = w_ref.shape[0]
    tm = lbl_ref.shape[1]
    tok = pl.ds(i, 1)             # scratch row for this token tile

    @pl.when(j == 0)
    def _init():
        m_ref[tok, :] = jnp.full((1, tm), _NEG, jnp.float32)
        l_ref[tok, :] = jnp.zeros((1, tm), jnp.float32)
        t_ref[tok, :] = jnp.zeros((1, tm), jnp.float32)

    # (TV, TM) logits tile: W[tv,H] contracted with X[tm,H] over H (trans-B MXU feed,
    # same structure as q @ k.T in flash attention). f32 accumulation.
    logits = lax.dot_general(
        w_ref[...], x_ref[...],
        dimension_numbers=(((1,), (1,)), ((), ())),
        preferred_element_type=jnp.float32)

    # Global vocab row ids for this tile (needed for the target gather anyway).
    row = j * tv + lax.broadcasted_iota(jnp.int32, (tv, tm), 0)
    if mask_tail:  # static: only when V % TV != 0 (ragged last vocab tile)
        logits = jnp.where(row < v_total, logits, _NEG)

    # Online logsumexp update over the vocab axis (axis 0), per lane (= per token).
    m_prev = m_ref[tok, :]
    m_new = jnp.maximum(m_prev, jnp.max(logits, axis=0, keepdims=True))
    alpha = jnp.exp(m_prev - m_new)
    l_ref[tok, :] = alpha * l_ref[tok, :] + jnp.sum(jnp.exp(logits - m_new),
                                                    axis=0, keepdims=True)
    m_ref[tok, :] = m_new

    # Target-logit extraction fused into the same pass (labels always < v_total).
    labels = lbl_ref[...]                                       # (1, TM) int32
    t_ref[tok, :] = t_ref[tok, :] + jnp.sum(jnp.where(row == labels, logits, 0.0),
                                            axis=0, keepdims=True)

    @pl.when(j == pl.num_programs(0) - 1)
    def _finish():
        # NLL = logsumexp - target_logit, lane-dense (1, TM).
        loss_ref[...] = m_ref[tok, :] + jnp.log(l_ref[tok, :]) - t_ref[tok, :]


@functools.partial(jax.jit, static_argnames=("tm", "tv", "cast_to_bf16"))
def gpt_cls_loss(hidden_states, input_ids, lm_head_weight, *, tm=None, tv=None,
                 cast_to_bf16=False):
    """hidden_states: [S, B, H] (f32 or bf16), input_ids: [B, S] int, weight: [V, H]."""
    S, B, H = hidden_states.shape
    V, H2 = lm_head_weight.shape
    assert H2 == H
    assert input_ids.shape == (B, S)
    N = S * B

    # --- layout plumbing (no full-tensor pads / transposes of x or W materialised) ---
    x = hidden_states.reshape(N, H)                             # token t = s*B + b
    w = lm_head_weight
    if cast_to_bf16 and x.dtype == jnp.float32:                 # optional bandwidth trade
        x = x.astype(jnp.bfloat16)
        w = w.astype(jnp.bfloat16)
    labels = jnp.transpose(input_ids, (1, 0)).reshape(1, N).astype(jnp.int32)

    x_bytes = jnp.dtype(x.dtype).itemsize
    w_bytes = jnp.dtype(w.dtype).itemsize

    # --- generation-aware VMEM budget (≈51 MiB on v7x, ≈102 MiB on v5e/v6e) ---
    vmem_cap = int(_vmem_capacity_bytes() * 0.8)

    # --- token tile: large (>= roofline crossover, fills the 256-wide MXU) ---
    tm_val = 512 if tm is None else int(tm)
    if N <= 128:
        tm_val = N                                  # single full-extent token tile
    else:
        tm_val = max(128, _round_up(tm_val, 128))
        tm_val = min(tm_val, (N // 128) * 128)      # block never exceeds the array dim

    # --- vocab tile: DMA-granularity knob; ~4 MiB (v7x) / ~8 MiB (v5e/v6e) weight tile ---
    if tv is None:
        tgt = (4 << 20) if vmem_cap < (60 << 20) else (8 << 20)
        tv_val = (tgt // max(1, H * w_bytes)) // 128 * 128
    else:
        tv_val = int(tv)
    if V <= 128:
        tv_val = V
    else:
        tv_val = max(128, _round_up(tv_val, 128))
        tv_val = min(tv_val, (V // 128) * 128)
        if tv is None:
            # Prefer a 128-multiple that divides V so the tail mask is statically elided.
            for cand in range(tv_val, max(128, tv_val // 2) - 1, -128):
                if V % cand == 0:
                    tv_val = cand
                    break

    def footprint(tm_, tv_):
        n_i_ = _cdiv(N, tm_)
        return (2 * tv_ * H * w_bytes              # weight tile (double-buffered)
                + 2 * tm_ * H * x_bytes            # activation tile (double-buffered)
                + 4 * tv_ * tm_ * 4                # logits tile + exp/select temporaries
                + 3 * _round_up(n_i_, 8) * tm_ * 4 # m/l/t scratch
                + 4 * 8 * tm_ * 4)                 # labels / per-token loss tiles

    while footprint(tm_val, tv_val) > vmem_cap and tv_val > 128:
        tv_val -= 128
    while footprint(tm_val, tv_val) > vmem_cap and tm_val > 128:
        tm_val -= 128
    tm, tv = tm_val, tv_val

    n_i = _cdiv(N, tm)            # token tiles (inner)
    n_j = _cdiv(V, tv)            # vocab tiles (outer; weight streamed once total)
    mask_tail = (V % tv) != 0

    vmem_limit = int(min(vmem_cap, max(32 << 20, 2 * footprint(tm, tv))))

    kernel = functools.partial(_ce_kernel, v_total=V, mask_tail=mask_tail)

    cost = pl.CostEstimate(
        flops=2 * N * V * H,
        transcendentals=N * V,
        bytes_accessed=(V * H * w_bytes           # weight: streamed exactly once
                        + n_j * N * H * x_bytes   # activations: once per vocab tile
                        + n_j * N * 4 + N * 4))   # labels / per-token loss

    per_token = pl.pallas_call(
        kernel,
        out_shape=jax.ShapeDtypeStruct((1, N), jnp.float32),
        grid_spec=pltpu.PrefetchScalarGridSpec(
            num_scalar_prefetch=0,
            grid=(n_j, n_i),                                   # vocab OUTER, tokens INNER
            in_specs=[
                pl.BlockSpec((tm, H), lambda j, i: (i, 0)),    # activation tile
                pl.BlockSpec((tv, H), lambda j, i: (j, 0)),    # weight tile (outer only)
                pl.BlockSpec((1, tm), lambda j, i: (0, i)),    # labels (lane-dense)
            ],
            out_specs=pl.BlockSpec((1, tm), lambda j, i: (0, i)),   # lane-dense loss
            scratch_shapes=[pltpu.VMEM((n_i, tm), jnp.float32)] * 3,
        ),
        compiler_params=pltpu.CompilerParams(
            dimension_semantics=("arbitrary", "arbitrary"),
            vmem_limit_bytes=vmem_limit,
        ),
        cost_estimate=cost,
    )(x, w, labels)

    # Mean over all S*B tokens == CrossEntropyLoss default / vocab_parallel_ce(...).mean().
    return jnp.mean(per_token)


def _reference_loss(hidden_states, input_ids, weight):
    logits = jnp.einsum("sbh,vh->sbv",
                        hidden_states.astype(jnp.float32),
                        weight.astype(jnp.float32),
                        precision=jax.lax.Precision.HIGHEST)
    labels = jnp.transpose(input_ids, (1, 0))
    lse = jax.scipy.special.logsumexp(logits, axis=-1)
    tgt = jnp.take_along_axis(logits, labels[..., None], axis=-1)[..., 0]
    return jnp.mean(lse - tgt)


if __name__ == "__main__":
    # Case 1: module-consistent small shapes (seq=8, batch=2, hidden=32, vocab=128),
    # f32, default (auto) tile sizing -> single vocab/token tile, no tail masking.
    S, B, H, V = 8, 2, 32, 128
    k1, k2, k3 = jax.random.split(jax.random.PRNGKey(0), 3)
    hidden_states = jax.random.normal(k1, (S, B, H), dtype=jnp.float32)
    input_ids = jax.random.randint(k2, (B, S), 0, V, dtype=jnp.int32)
    lm_head_weight = (jax.random.normal(k3, (V, H), dtype=jnp.float32)
                      * (1.0 / jnp.sqrt(float(H))))

    loss = jax.block_until_ready(gpt_cls_loss(hidden_states, input_ids, lm_head_weight))
    ref = _reference_loss(hidden_states, input_ids, lm_head_weight)
    assert jnp.allclose(loss, ref, rtol=1e-4, atol=1e-4), (loss, ref)

    # Case 2: bf16 operands, ragged vocab (1000 % 256 != 0) and ragged token
    # (160 % 128 != 0) tiles, multi-tile grid on both axes -> exercises the online LSE
    # across vocab tiles, the in-kernel tail mask and out-of-bounds lane dropping.
    S2, B2, H2, V2 = 40, 4, 64, 1000
    k4, k5, k6 = jax.random.split(jax.random.PRNGKey(0), 3)
    hs2 = jax.random.normal(k4, (S2, B2, H2), dtype=jnp.float32).astype(jnp.bfloat16)
    ids2 = jax.random.randint(k5, (B2, S2), 0, V2, dtype=jnp.int32)
    w2 = (jax.random.normal(k6, (V2, H2), dtype=jnp.float32)
          * (1.0 / jnp.sqrt(float(H2)))).astype(jnp.bfloat16)

    loss2 = jax.block_until_ready(gpt_cls_loss(hs2, ids2, w2, tm=128, tv=256))
    ref2 = _reference_loss(hs2, ids2, w2)
    assert jnp.allclose(loss2, ref2, rtol=2e-3, atol=2e-3), (loss2, ref2)

    print("KERNEL_OK")
</pallas_src>

<mosaic_0001>
module attributes {stable_mosaic.version = 11 : i64} {
  func.func @_ce_kernel(%arg0: i32, %arg1: i32, %arg2: memref<16x32xf32, #tpu.memory_space<vmem>>, %arg3: memref<128x32xf32, #tpu.memory_space<vmem>>, %arg4: memref<1x16xi32, #tpu.memory_space<vmem>>, %arg5: memref<1x16xf32, #tpu.memory_space<vmem>>, %arg6: memref<1x16xf32, #tpu.memory_space<vmem>>, %arg7: memref<1x16xf32, #tpu.memory_space<vmem>>, %arg8: memref<1x16xf32, #tpu.memory_space<vmem>>) attributes {dimension_semantics = [#tpu.dimension_semantics<arbitrary>, #tpu.dimension_semantics<arbitrary>], iteration_bounds = array<i64: 1, 1>, scalar_prefetch = 0 : i64, scratch_operands = 3 : i64, tpu.core_type = #tpu.core_type<tc>, window_params = [{transform_indices = @transform_0, window_bounds = array<i64: 16, 32>}, {transform_indices = @transform_1, window_bounds = array<i64: 128, 32>}, {transform_indices = @transform_2, window_bounds = array<i64: 1, 16>}, {transform_indices = @transform_3, window_bounds = array<i64: 1, 16>}]} {
    %c0_i32 = arith.constant 0 : i32
    %0 = arith.cmpi eq, %arg0, %c0_i32 : i32
    %1 = arith.extui %0 : i1 to i32
    %c0_i32_0 = arith.constant 0 : i32
    %2 = arith.cmpi ne, %1, %c0_i32_0 : i32
    scf.if %2 {
      %cst_18 = arith.constant -1.000000e+30 : f32
      %45 = vector.broadcast %cst_18 : f32 to vector<1x16xf32>
      %46 = arith.index_cast %arg1 : i32 to index
      %c0_19 = arith.constant 0 : index
      %47 = vector.load %arg6[%46, %c0_19] : memref<1x16xf32, #tpu.memory_space<vmem>>, vector<1x16xf32>
      tpu.vector_store %arg6[%46, %c0_19], %45 {strides = array<i32>} : memref<1x16xf32, #tpu.memory_space<vmem>>, vector<1x16xf32>,
      %cst_20 = arith.constant 0.000000e+00 : f32
      %48 = vector.broadcast %cst_20 : f32 to vector<1x16xf32>
      %49 = arith.index_cast %arg1 : i32 to index
      %c0_21 = arith.constant 0 : index
      %50 = vector.load %arg7[%49, %c0_21] : memref<1x16xf32, #tpu.memory_space<vmem>>, vector<1x16xf32>
      tpu.vector_store %arg7[%49, %c0_21], %48 {strides = array<i32>} : memref<1x16xf32, #tpu.memory_space<vmem>>, vector<1x16xf32>,
      %cst_22 = arith.constant 0.000000e+00 : f32
      %51 = vector.broadcast %cst_22 : f32 to vector<1x16xf32>
      %52 = arith.index_cast %arg1 : i32 to index
      %c0_23 = arith.constant 0 : index
      %53 = vector.load %arg8[%52, %c0_23] : memref<1x16xf32, #tpu.memory_space<vmem>>, vector<1x16xf32>
      tpu.vector_store %arg8[%52, %c0_23], %51 {strides = array<i32>} : memref<1x16xf32, #tpu.memory_space<vmem>>, vector<1x16xf32>,
    } else {
    }
    %c0 = arith.constant 0 : index
    %c0_1 = arith.constant 0 : index
    %3 = vector.load %arg3[%c0, %c0_1] : memref<128x32xf32, #tpu.memory_space<vmem>>, vector<128x32xf32>
    %c0_2 = arith.constant 0 : index
    %c0_3 = arith.constant 0 : index
    %4 = vector.load %arg2[%c0_2, %c0_3] : memref<16x32xf32, #tpu.memory_space<vmem>>, vector<16x32xf32>
    %cst = arith.constant dense<0.000000e+00> : vector<128x16xf32>
    %5 = tpu.matmul %3, %4, %cst {dimension_numbers = #tpu.dot_dimension_numbers<[1], [1], [0], [0], [0, 0, 1, 0], [], []>} : vector<128x32xf32>, vector<16x32xf32>, vector<128x16xf32> -> vector<128x16xf32>
    %c128_i32 = arith.constant 128 : i32
    %6 = arith.muli %arg0, %c128_i32 : i32
    %7 = tpu.iota {dimensions = array<i32: 0>} : vector<128x16xi32>
    %8 = vector.broadcast %6 : i32 to vector<128x16xi32>
    %9 = arith.addi %8, %7 : vector<128x16xi32>
    %10 = arith.index_cast %arg1 : i32 to index
    %c0_4 = arith.constant 0 : index
    %11 = vector.load %arg6[%10, %c0_4] : memref<1x16xf32, #tpu.memory_space<vmem>>, vector<1x16xf32>
    %cst_5 = arith.constant dense<0xFF800000> : vector<16xf32>
    %12 = vector.multi_reduction <maximumf>, %5, %cst_5 [0] : vector<128x16xf32> to vector<16xf32>
    %13 = vector.shape_cast %12 : vector<16xf32> to vector<1x16xf32>
    %14 = arith.maximumf %11, %13 : vector<1x16xf32>
    %15 = arith.subf %11, %14 : vector<1x16xf32>
    %16 = math.exp %15 : vector<1x16xf32>
    %17 = arith.index_cast %arg1 : i32 to index
    %c0_6 = arith.constant 0 : index
    %18 = vector.load %arg7[%17, %c0_6] : memref<1x16xf32, #tpu.memory_space<vmem>>, vector<1x16xf32>
    %19 = arith.mulf %16, %18 : vector<1x16xf32>
    %20 = vector.broadcast %14 : vector<1x16xf32> to vector<128x16xf32>
    %21 = arith.subf %5, %20 : vector<128x16xf32>
    %22 = math.exp %21 : vector<128x16xf32>
    %cst_7 = arith.constant dense<0.000000e+00> : vector<16xf32>
    %23 = vector.multi_reduction <add>, %22, %cst_7 [0] : vector<128x16xf32> to vector<16xf32>
    %24 = vector.shape_cast %23 : vector<16xf32> to vector<1x16xf32>
    %25 = arith.addf %19, %24 : vector<1x16xf32>
    %26 = arith.index_cast %arg1 : i32 to index
    %c0_8 = arith.constant 0 : index
    %27 = vector.load %arg7[%26, %c0_8] : memref<1x16xf32, #tpu.memory_space<vmem>>, vector<1x16xf32>
    tpu.vector_store %arg7[%26, %c0_8], %25 {strides = array<i32>} : memref<1x16xf32, #tpu.memory_space<vmem>>, vector<1x16xf32>,
    %28 = arith.index_cast %arg1 : i32 to index
    %c0_9 = arith.constant 0 : index
    %29 = vector.load %arg6[%28, %c0_9] : memref<1x16xf32, #tpu.memory_space<vmem>>, vector<1x16xf32>
    tpu.vector_store %arg6[%28, %c0_9], %14 {strides = array<i32>} : memref<1x16xf32, #tpu.memory_space<vmem>>, vector<1x16xf32>,
    %c0_10 = arith.constant 0 : index
    %c0_11 = arith.constant 0 : index
    %30 = vector.load %arg4[%c0_10, %c0_11] : memref<1x16xi32, #tpu.memory_space<vmem>>, vector<1x16xi32>
    %31 = arith.index_cast %arg1 : i32 to index
    %c0_12 = arith.constant 0 : index
    %32 = vector.load %arg8[%31, %c0_12] : memref<1x16xf32, #tpu.memory_space<vmem>>, vector<1x16xf32>
    %33 = vector.broadcast %30 : vector<1x16xi32> to vector<128x16xi32>
    %34 = arith.cmpi eq, %9, %33 : vector<128x16xi32>
    %cst_13 = arith.constant 0.000000e+00 : f32
    %35 = vector.broadcast %cst_13 : f32 to vector<128x16xf32>
    %36 = arith.select %34, %5, %35 : vector<128x16xi1>, vector<128x16xf32>
    %cst_14 = arith.constant dense<0.000000e+00> : vector<16xf32>
    %37 = vector.multi_reduction <add>, %36, %cst_14 [0] : vector<128x16xf32> to vector<16xf32>
    %38 = vector.shape_cast %37 : vector<16xf32> to vector<1x16xf32>
    %39 = arith.addf %32, %38 : vector<1x16xf32>
    %40 = arith.index_cast %arg1 : i32 to index
    %c0_15 = arith.constant 0 : index
    %41 = vector.load %arg8[%40, %c0_15] : memref<1x16xf32, #tpu.memory_space<vmem>>, vector<1x16xf32>
    tpu.vector_store %arg8[%40, %c0_15], %39 {strides = array<i32>} : memref<1x16xf32, #tpu.memory_space<vmem>>, vector<1x16xf32>,
    %c0_i32_16 = arith.constant 0 : i32
    %42 = arith.cmpi eq, %arg0, %c0_i32_16 : i32
    %43 = arith.extui %42 : i1 to i32
    %c0_i32_17 = arith.constant 0 : i32
    %44 = arith.cmpi ne, %43, %c0_i32_17 : i32
    scf.if %44 {
      %45 = arith.index_cast %arg1 : i32 to index
      %c0_18 = arith.constant 0 : index
      %46 = vector.load %arg6[%45, %c0_18] : memref<1x16xf32, #tpu.memory_space<vmem>>, vector<1x16xf32>
      %47 = arith.index_cast %arg1 : i32 to index
      %c0_19 = arith.constant 0 : index
      %48 = vector.load %arg7[%47, %c0_19] : memref<1x16xf32, #tpu.memory_space<vmem>>, vector<1x16xf32>
      %49 = math.log %48 : vector<1x16xf32>
      %50 = arith.addf %46, %49 : vector<1x16xf32>
      %51 = arith.index_cast %arg1 : i32 to index
      %c0_20 = arith.constant 0 : index
      %52 = vector.load %arg8[%51, %c0_20] : memref<1x16xf32, #tpu.memory_space<vmem>>, vector<1x16xf32>
      %53 = arith.subf %50, %52 : vector<1x16xf32>
      %c0_21 = arith.constant 0 : index
      %c0_22 = arith.constant 0 : index
      %54 = vector.load %arg5[%c0_21, %c0_22] : memref<1x16xf32, #tpu.memory_space<vmem>>, vector<1x16xf32>
      tpu.vector_store %arg5[%c0_21, %c0_22], %53 {strides = array<i32>} : memref<1x16xf32, #tpu.memory_space<vmem>>, vector<1x16xf32>,
    } else {
    }
    return
  }
  func.func @transform_0(%arg0: i32, %arg1: i32) -> (i32, i32) {
    %c0_i32 = arith.constant 0 : i32
    %c0_i32_0 = arith.constant 0 : i32
    return %arg1, %c0_i32 : i32, i32
  }
  func.func @transform_1(%arg0: i32, %arg1: i32) -> (i32, i32) {
    %c0_i32 = arith.constant 0 : i32
    %c0_i32_0 = arith.constant 0 : i32
    return %arg0, %c0_i32 : i32, i32
  }
  func.func @transform_2(%arg0: i32, %arg1: i32) -> (i32, i32) {
    %c0_i32 = arith.constant 0 : i32
    %c0_i32_0 = arith.constant 0 : i32
    return %c0_i32, %arg1 : i32, i32
  }
  func.func @transform_3(%arg0: i32, %arg1: i32) -> (i32, i32) {
    %c0_i32 = arith.constant 0 : i32
    %c0_i32_0 = arith.constant 0 : i32
    return %c0_i32, %arg1 : i32, i32
  }
}

</mosaic_0001>

<bundles_post_ra>
// kernel: gpt_cls_loss.1
= control target key start
LH: loop header
LB: loop body
LE: loop exit
PB: predicated region body
PF: predicated region fallthrough
CT: control target
= control target key end

     0   :  { %vm40_vm0 = vcmask 261120   ;;  %vm18_vm1 = vcmask 122880   ;;  %v614_v18 = vmov -1e+30   ;;  %v615_v19 = vmov 0.0   ;;  %s949_s0 = inlined_call_operand.vmem [shape: f32[16,32], index: 0, kind: input, shape index: {}]   ;;  %s950_s1 = inlined_call_operand.vmem [shape: f32[128,32], index: 1, kind: input, shape index: {}]   ;;  %s951_s2 = inlined_call_operand.vmem [shape: s32[1,16], index: 2, kind: input, shape index: {}]   ;;  %s952_s3 = inlined_call_operand.vmem [shape: f32[1,16], index: 3, kind: output, shape index: {}]  }
   0x1   :  { %v39_v0 = vld [vmem:[%s949_s0 + $0x8] sm:$0xff]  ;;  %v38_v1 = vld [vmem:[%s949_s0] sm:$0xff]  ;;  %v24_v6 = vld [vmem:[%s950_s1 + $0x10] sm:$0xff]  ;;  %19 = vst.msk [vmem:[#allocation2] sm:$0x1] %vm18_vm1, %v614_v18  ;;  %v241_v20 = vlaneseq  ;;  %vm276_vm4 = vcmask 130048  }
   0x2   :  { %544 = vmatprep.subr.msk.mxu0 %vm40_vm0, %v39_v0  ;;  %572 = vmatprep.subr.msk.mxu1 %vm40_vm0, %v39_v0  ;;  %v22_v2 = vld [vmem:[%s950_s1] sm:$0xff]  ;;  %v23_v4 = vld [vmem:[%s950_s1 + $0x8] sm:$0xff]  ;;  %v32_v7 = vld [vmem:[%s950_s1 + $0x50] sm:$0xff]  ;;  %20 = vst.msk [vmem:[#allocation3] sm:$0x1] %vm18_vm1, %v615_v19 }
   0x3   :  { %v30_v3 = vld [vmem:[%s950_s1 + $0x40] sm:$0xff]  ;;  %545 = vmatpush3.xpose.msk.msra.mxu0 %vm40_vm0, %v39_v0  ;;  %574 = vmatpush3.xpose.msk.msra.mxu1 %vm40_vm0, %v39_v0  ;;  %v31_v5 = vld [vmem:[%s950_s1 + $0x48] sm:$0xff]  ;;  %v25_v8 = vld [vmem:[%s950_s1 + $0x18] sm:$0xff]  ;;  %21 = vst.msk [vmem:[#allocation4] sm:$0x1] %vm18_vm1, %v615_v19  ;;  %v717_v21 = vshrl.u32 %v241_v20, 7 }
   0x4   :  { %546 = vmatprep.subr.msk.mxu0 %vm40_vm0, %v38_v1  ;;  %573 = vmatprep.subr.msk.mxu1 %vm40_vm0, %v38_v1  ;;  %v33_v9 = vld [vmem:[%s950_s1 + $0x58] sm:$0xff]  ;;  %v26_v10 = vld [vmem:[%s950_s1 + $0x20] sm:$0xff]  ;;  %v27_v12 = vld [vmem:[%s950_s1 + $0x28] sm:$0xff] }
   0x5   :  { %548 = vmatprep.mubr.msk.f32.mxu0 %vm40_vm0, %v22_v2  ;;  %560 = vmatprep.mubr.msk.f32.mxu1 %vm40_vm0, %v30_v3  ;;  %v34_v11 = vld [vmem:[%s950_s1 + $0x60] sm:$0xff]  ;;  %v35_v13 = vld [vmem:[%s950_s1 + $0x68] sm:$0xff]  ;;  %v28_v14 = vld [vmem:[%s950_s1 + $0x30] sm:$0xff]  ;;  %v243_v22 = vadd.s32 8, %v717_v21  ;;  %v245_v24 = vadd.s32 24, %v717_v21  ;;  %v244_v27 = vadd.s32 16, %v717_v21 }
   0x6   :  { %v36_v15 = vld [vmem:[%s950_s1 + $0x70] sm:$0xff]  ;;  %v29_v16 = vld [vmem:[%s950_s1 + $0x38] sm:$0xff]  ;;  %v723_v23 = vld [vmem:[%s951_s2] ss:$0 sm:$0xff]  ;;  %v250_v28 = vadd.s32 64, %v717_v21  ;;  %v738_v30 = vadd.s32 72, %v717_v21 }
   0x7   :  { %547 = vmatpush3.xpose.msk.msra.mxu0 %vm40_vm0, %v38_v1  ;;  %575 = vmatpush3.xpose.msk.msra.mxu1 %vm40_vm0, %v38_v1  ;;  %v37_v17 = vld [vmem:[%s950_s1 + $0x78] sm:$0xff]  ;;  %vm422_vm2 = vcmp.eq.s32.totalorder %v243_v22, %v723_v23  ;;  %vm421_vm3 = vcmp.eq.s32.totalorder %v717_v21, %v723_v23  ;;  %v247_v32 = vadd.s32 40, %v717_v21  ;;  %vm424_vm5 = vcmp.eq.s32.totalorder %v245_v24, %v723_v23 }
   0x8   :  { %v246_v35 = vadd.s32 32, %v717_v21  ;;  %vm423_vm6 = vcmp.eq.s32.totalorder %v244_v27, %v723_v23  ;;  %v249_v39 = vadd.s32 56, %v717_v21  ;;  %v248_v40 = vadd.s32 48, %v717_v21 }
   0x9   :  { %vm429_vm7 = vcmp.eq.s32.totalorder %v250_v28, %v723_v23  ;;  %v760_v43 = vadd.s32 88, %v717_v21  ;;  %vm426_vm8 = vcmp.eq.s32.totalorder %v247_v32, %v723_v23  ;;  %v766_v45 = vadd.s32 80, %v717_v21 }
   0xa   :  { %549 = vmatmul.mubr.msk.f32.vlgmr.msra.gmra.mxu0 %vm40_vm0, %v23_v4  ;;  %561 = vmatmul.mubr.msk.f32.vlgmr.msra.gmra.mxu1 %vm40_vm0, %v31_v5  ;;  %vm425_vm9 = vcmp.eq.s32.totalorder %v246_v35, %v723_v23  ;;  %vm430_vm10 = vcmp.eq.s32.totalorder %v738_v30, %v723_v23  ;;  %vm428_vm11 = vcmp.eq.s32.totalorder %v249_v39, %v723_v23  ;;  %v782_v52 = vadd.s32 96, %v717_v21 }
   0xb   :  { %551 = vmatprep.mubr.msk.f32.mxu0 %vm40_vm0, %v24_v6  ;;  %563 = vmatprep.mubr.msk.f32.mxu1 %vm40_vm0, %v32_v7  ;;  %vm427_vm12 = vcmp.eq.s32.totalorder %v248_v40, %v723_v23  ;;  %vm432_vm13 = vcmp.eq.s32.totalorder %v760_v43, %v723_v23  ;;  %vm431_vm14 = vcmp.eq.s32.totalorder %v766_v45, %v723_v23 }
   0xc   :  { %vm433_vm15 = vcmp.eq.s32.totalorder %v782_v52, %v723_v23 }
   0xe   :  { %552 = vmatmul.mubr.msk.f32.gmra.mxu0 %vm40_vm0, %v25_v8  ;;  %564 = vmatmul.mubr.msk.f32.gmra.mxu1 %vm40_vm0, %v33_v9 }
   0xf   :  { %554 = vmatprep.mubr.msk.f32.mxu0 %vm40_vm0, %v26_v10  ;;  %566 = vmatprep.mubr.msk.f32.mxu1 %vm40_vm0, %v34_v11 }
  0x12   :  { %555 = vmatmul.mubr.msk.f32.gmra.mxu0 %vm40_vm0, %v27_v12  ;;  %567 = vmatmul.mubr.msk.f32.gmra.mxu1 %vm40_vm0, %v35_v13 }
  0x13   :  { %557 = vmatprep.mubr.msk.f32.mxu0 %vm40_vm0, %v28_v14  ;;  %569 = vmatprep.mubr.msk.f32.mxu1 %vm40_vm0, %v36_v15 }
  0x16   :  { %558 = vmatmul.mubr.msk.f32.gmra.mxu0 %vm40_vm0, %v29_v16  ;;  %570 = vmatmul.mubr.msk.f32.gmra.mxu1 %vm40_vm0, %v37_v17 }
  0xca   :  { %v726_v25 = vpop.f32.mrf.mxu0  ;;  %v731_v26 = vpop.f32.mrf.mxu1 }
  0xcb   :  { %v438_v33 = vsel %vm422_vm2, %v726_v25, 0.0  ;;  %v278_v53 = vsel %vm276_vm4, %v726_v25, -inf  ;;  %v291_v54 = vsel %vm276_vm4, %v731_v26, -inf }
  0xcc   :  { %v735_v29 = vpop.f32.mrf.mxu0  ;;  %v740_v31 = vpop.f32.mrf.mxu1  ;;  %v454_v41 = vsel %vm276_vm4, %v438_v33, 0.0 }
  0xcd   :  { %v437_v34 = vsel %vm421_vm3, %v735_v29, 0.0  ;;  %v277_v57 = vsel %vm276_vm4, %v735_v29, -inf  ;;  %v289_v59 = vsel %vm276_vm4, %v740_v31, -inf  ;;  %v445_v60 = vsel %vm429_vm7, %v740_v31, 0.0 }
  0xce   :  { %v453_v36 = vsel %vm276_vm4, %v437_v34, 0.0  ;;  %v748_v37 = vpop.f32.mrf.mxu0  ;;  %v751_v38 = vpop.f32.mrf.mxu1 }
  0xcf   :  { %v455_v46 = vadd.f32 %v454_v41, %v453_v36  ;;  %v440_v47 = vsel %vm424_vm5, %v748_v37, 0.0  ;;  %v280_v3 = vsel %vm276_vm4, %v748_v37, -inf  ;;  %v295_v10 = vsel %vm276_vm4, %v751_v38, -inf }
  0xd0   :  { %v757_v42 = vpop.f32.mrf.mxu0  ;;  %v763_v44 = vpop.f32.mrf.mxu1  ;;  %v458_v58 = vsel %vm276_vm4, %v440_v47, 0.0  ;;  %v446_v47 = vsel %vm430_vm10, %v731_v26, 0.0 }
  0xd1   :  { %v439_v48 = vsel %vm423_vm6, %v757_v42, 0.0  ;;  %v279_v9 = vsel %vm276_vm4, %v757_v42, -inf  ;;  %v293_v14 = vsel %vm276_vm4, %v763_v44, -inf  ;;  %v470_v30 = vsel %vm276_vm4, %v446_v47, 0.0 }
  0xd2   :  { %v456_v49 = vsel %vm276_vm4, %v439_v48, 0.0  ;;  %v776_v50 = vpop.f32.mrf.mxu0  ;;  %v778_v51 = vpop.f32.mrf.mxu1  ;;  %v255_v48 = vadd.s32 104, %v717_v21 }
  0xd3   :  { %v457_v55 = vadd.f32 %v456_v49, %v455_v46  ;;  %v283_v56 = vsel %vm276_vm4, %v776_v50, -inf  ;;  %v442_v63 = vsel %vm426_vm8, %v776_v50, 0.0  ;;  %v299_v34 = vsel %vm276_vm4, %v778_v51, -inf }
  0xd4   :  { %v799_v61 = vpop.f32.mrf.mxu0  ;;  %v801_v62 = vpop.f32.mrf.mxu1  ;;  %v284_v4 = vmax.f32 %v278_v53, %v283_v56  ;;  %v462_v13 = vsel %vm276_vm4, %v442_v63, 0.0  ;;  %v256_v63 = vadd.s32 112, %v717_v21  ;;  %vm434_vm0 = vcmp.eq.s32.totalorder %v255_v48, %v723_v23 }
  0xd5   :  { %v281_v0 = vsel %vm276_vm4, %v799_v61, -inf  ;;  %v441_v1 = vsel %vm425_vm9, %v799_v61, 0.0  ;;  %v459_v2 = vadd.f32 %v458_v58, %v457_v55  ;;  %v297_v35 = vsel %vm276_vm4, %v801_v62, -inf }
  0xd6   :  { %v282_v5 = vmax.f32 %v277_v57, %v281_v0  ;;  %v460_v6 = vsel %vm276_vm4, %v441_v1, 0.0  ;;  %v816_v7 = vpop.f32.mrf.mxu0  ;;  %v818_v8 = vpop.f32.mrf.mxu1  ;;  %v292_v24 = vmax.f32 %v284_v4, %v291_v54  ;;  %v468_v54 = vsel %vm276_vm4, %v445_v60, 0.0 }
  0xd7   :  { %v461_v11 = vadd.f32 %v460_v6, %v459_v2  ;;  %v287_v12 = vsel %vm276_vm4, %v816_v7, -inf  ;;  %v444_v18 = vsel %vm428_vm11, %v816_v7, 0.0  ;;  %v303_v39 = vsel %vm276_vm4, %v818_v8, -inf }
  0xd8   :  { %v288_v15 = vmax.f32 %v280_v3, %v287_v12  ;;  %v290_v16 = vmax.f32 %v282_v5, %v289_v59  ;;  %v829_v17 = vpop.f32.mrf.mxu0  ;;  %v840_v33 = vpop.f32.mrf.mxu1  ;;  %v466_v40 = vsel %vm276_vm4, %v444_v18, 0.0  ;;  %v300_v55 = vmax.f32 %v292_v24, %v299_v34 }
  0xd9   :  { %v285_v19 = vsel %vm276_vm4, %v829_v17, -inf  ;;  %v443_v20 = vsel %vm427_vm12, %v829_v17, 0.0  ;;  %v463_v22 = vadd.f32 %v462_v13, %v461_v11  ;;  %v301_v53 = vsel %vm276_vm4, %v840_v33, -inf }
  0xda   :  { %v286_v27 = vmax.f32 %v279_v9, %v285_v19  ;;  %v464_v28 = vsel %vm276_vm4, %v443_v20, 0.0  ;;  %v296_v32 = vmax.f32 %v288_v15, %v295_v10  ;;  %v298_v41 = vmax.f32 %v290_v16, %v297_v35 }
  0xdb   :  { %v465_v36 = vadd.f32 %v464_v28, %v463_v22  ;;  %v447_v57 = vsel %vm431_vm14, %v763_v44, 0.0  ;;  %v448_v60 = vsel %vm432_vm13, %v751_v38, 0.0  ;;  %v257_v3 = vadd.s32 120, %v717_v21 }
  0xdc   :  { %v294_v46 = vmax.f32 %v286_v27, %v293_v14  ;;  %v304_v56 = vmax.f32 %v296_v32, %v303_v39  ;;  %v305_v59 = vmax.f32 %v298_v41, %v300_v55  ;;  %v472_v2 = vsel %vm276_vm4, %v447_v57, 0.0  ;;  %v882_v32 = vld [vmem:[#allocation2] sm:$0x1] }
  0xdd   :  { %v467_v49 = vadd.f32 %v466_v40, %v465_v36  ;;  %v449_v4 = vsel %vm433_vm15, %v801_v62, 0.0  ;;  %v474_v6 = vsel %vm276_vm4, %v448_v60, 0.0  ;;  %vm435_vm2 = vcmp.eq.s32.totalorder %v256_v63, %v723_v23 }
  0xde   :  { %v302_v45 = vmax.f32 %v294_v46, %v301_v53  ;;  %v450_v10 = vsel %vm434_vm0, %v778_v51, 0.0  ;;  %v476_v11 = vsel %vm276_vm4, %v449_v4, 0.0  ;;  %vm436_vm3 = vcmp.eq.s32.totalorder %v257_v3, %v723_v23 }
  0xdf   :  { %v469_v58 = vadd.f32 %v468_v54, %v467_v49  ;;  %v451_v13 = vsel %vm435_vm2, %v840_v33, 0.0  ;;  %v478_v15 = vsel %vm276_vm4, %v450_v10, 0.0  ;;  %v452_v18 = vsel %vm436_vm3, %v818_v8, 0.0 }
  0xe0   :  { %v306_v0 = vmax.f32 %v302_v45, %v304_v56  ;;  %v480_v22 = vsel %vm276_vm4, %v451_v13, 0.0  ;;  %v482_v27 = vsel %vm276_vm4, %v452_v18, 0.0  ;;  %v323_v35 = vsub.s32 0, %v717_v21 }
  0xe1   :  { %v471_v1 = vadd.f32 %v470_v30, %v469_v58  ;;  %v416_v30 = vld [vmem:[#allocation4] sm:$0x1] }
  0xe2   :  { %v307_v52 = vmax.f32 %v305_v59, %v306_v0 }
  0xe3   :  { %v473_v5 = vadd.f32 %v472_v2, %v471_v1 }
  0xe4   :  { %v308_v9 = vrot.slane %v307_v52, 4 }
  0xe5   :  { %v475_v43 = vadd.f32 %v474_v6, %v473_v5 }
  0xe6   :  { %v309_v12 = vmax.f32 %v307_v52, %v308_v9 }
  0xe7   :  { %v477_v14 = vadd.f32 %v476_v11, %v475_v43 }
  0xe8   :  { %v310_v16 = vrot.slane %v309_v12, 2 }
  0xe9   :  { %v479_v19 = vadd.f32 %v478_v15, %v477_v14 }
  0xea   :  { %v311_v20 = vmax.f32 %v309_v12, %v310_v16 }
  0xeb   :  { %v481_v24 = vadd.f32 %v480_v22, %v479_v19 }
  0xec   :  { %v312_v28 = vrot.slane %v311_v20, 1 }
  0xed   :  { %v483_v23 = vadd.f32 %v482_v27, %v481_v24 }
  0xee   :  { %v313_v34 = vmax.f32 %v311_v20, %v312_v28 }
  0xef   :  { %v484_v36 = vrot.slane %v483_v23, 4 }
  0xf0   :  { %v886_v39 = vmax.f32 %v882_v32, %v313_v34 }
  0xf1   :  { %v485_v40 = vadd.f32 %v484_v36, %v483_v23 }
  0xf2   :  { %v889_v41 = vrot.slane %v886_v39, %v323_v35  ;;  %414 = vst.msk [vmem:[#allocation2] sm:$0x1] %vm18_vm1, %v886_v39 }
  0xf3   :  { %v486_v49 = vrot.slane %v485_v40, 2 }
  0xf4   :  { %v326_v46 = vsub.f32 %v735_v29, %v889_v41  ;;  %v327_v47 = vsub.f32 %v726_v25, %v889_v41  ;;  %v328_v21 = vsub.f32 %v757_v42, %v889_v41  ;;  %v329_v48 = vsub.f32 %v748_v37, %v889_v41 }
  0xf5   :  { %v330_v53 = vsub.f32 %v799_v61, %v889_v41  ;;  %v331_v56 = vsub.f32 %v776_v50, %v889_v41  ;;  %v487_v57 = vadd.f32 %v486_v49, %v485_v40  ;;  %v332_v25 = vsub.f32 %v829_v17, %v889_v41 }
  0xf6   :  { %v342_v54 = vmul.f32 1.442695, %v326_v46  ;;  %v344_v55 = vmul.f32 1.442695, %v327_v47  ;;  %v346_v45 = vmul.f32 1.442695, %v328_v21  ;;  %v333_v37 = vsub.f32 %v816_v7, %v889_v41 }
  0xf7   :  { %v348_v29 = vmul.f32 1.442695, %v329_v48  ;;  %v350_v42 = vmul.f32 1.442695, %v330_v53  ;;  %v352_v61 = vmul.f32 1.442695, %v331_v56  ;;  %v334_v50 = vsub.f32 %v740_v31, %v889_v41 }
  0xf8   :  { %578 = vpow2.f32 %v342_v54  ;;  %v488_v58 = vrot.slane %v487_v57, 1  ;;  %v354_v59 = vmul.f32 1.442695, %v332_v25  ;;  %v335_v0 = vsub.f32 %v731_v26, %v889_v41 }
  0xf9   :  { %580 = vpow2.f32 %v344_v55  ;;  %v356_v17 = vmul.f32 1.442695, %v333_v37  ;;  %v336_v1 = vsub.f32 %v763_v44, %v889_v41  ;;  %v358_v7 = vmul.f32 1.442695, %v334_v50 }
  0xfa   :  { %582 = vpow2.f32 %v346_v45  ;;  %v489_v63 = vadd.f32 %v488_v58, %v487_v57  ;;  %v337_v2 = vsub.f32 %v751_v38, %v889_v41  ;;  %v360_v31 = vmul.f32 1.442695, %v335_v0 }
  0xfb   :  { %584 = vpow2.f32 %v348_v29  ;;  %v338_v52 = vsub.f32 %v801_v62, %v889_v41  ;;  %v362_v26 = vmul.f32 1.442695, %v336_v1  ;;  %v339_v44 = vsub.f32 %v778_v51, %v889_v41 }
  0xfc   :  { %586 = vpow2.f32 %v350_v42  ;;  %v490_v60 = vadd.f32 %v489_v63, %v416_v30  ;;  %v364_v9 = vmul.f32 1.442695, %v337_v2  ;;  %v340_v11 = vsub.f32 %v840_v33, %v889_v41 }
  0xfd   :  { %588 = vpow2.f32 %v352_v61  ;;  %v366_v62 = vmul.f32 1.442695, %v338_v52  ;;  %v341_v15 = vsub.f32 %v818_v8, %v889_v41  ;;  %v368_v51 = vmul.f32 1.442695, %v339_v44 }
  0xfe   :  { %590 = vpow2.f32 %v354_v59  ;;  %491 = vst.msk [vmem:[#allocation4] sm:$0x1] %vm18_vm1, %v490_v60  ;;  %v370_v20 = vmul.f32 1.442695, %v340_v11  ;;  %v315_v54 = vsub.f32 %v882_v32, %v886_v39 }
  0xff   :  { %592 = vpow2.f32 %v356_v17  ;;  %v372_v27 = vmul.f32 1.442695, %v341_v15 }
 0x100   :  { %594 = vpow2.f32 %v358_v7  ;;  %v316_v42 = vmul.f32 1.442695, %v315_v54 }
 0x101   :  { %596 = vpow2.f32 %v360_v31 }
 0x102   :  { %598 = vpow2.f32 %v362_v26 }
 0x103   :  { %600 = vpow2.f32 %v364_v9 }
 0x104   :  { %602 = vpow2.f32 %v366_v62 }
 0x105   :  { %v579_v3 = vpop.eup %578  ;;  %604 = vpow2.f32 %v368_v51 }
 0x106   :  { %v581_v4 = vpop.eup %580  ;;  %v374_v5 = vsel %vm276_vm4, %v579_v3, 0.0  ;;  %606 = vpow2.f32 %v370_v20  ;;  %v318_v3 = vld [vmem:[#allocation3] sm:$0x1] }
 0x107   :  { %v583_v6 = vpop.eup %582  ;;  %v375_v10 = vsel %vm276_vm4, %v581_v4, 0.0  ;;  %608 = vpow2.f32 %v372_v27 }
 0x108   :  { %v585_v38 = vpop.eup %584  ;;  %v376_v43 = vadd.f32 %v375_v10, %v374_v5  ;;  %v377_v12 = vsel %vm276_vm4, %v583_v6, 0.0  ;;  %610 = vpow2.f32 %v316_v42  ;;  %v495_v10 = vld [vmem:[#allocation2] sm:$0x1] }
 0x109   :  { %v587_v13 = vpop.eup %586  ;;  %v379_v16 = vsel %vm276_vm4, %v585_v38, 0.0 }
 0x10a   :  { %v378_v14 = vadd.f32 %v377_v12, %v376_v43  ;;  %v589_v18 = vpop.eup %588  ;;  %v381_v22 = vsel %vm276_vm4, %v587_v13, 0.0  ;;  %v500_v43 = vld [vmem:[#allocation4] sm:$0x1] }
 0x10b   :  { %v591_v33 = vpop.eup %590  ;;  %v383_v28 = vsel %vm276_vm4, %v589_v18, 0.0 }
 0x10c   :  { %v380_v19 = vadd.f32 %v379_v16, %v378_v14  ;;  %v593_v23 = vpop.eup %592  ;;  %v385_v8 = vsel %vm276_vm4, %v591_v33, 0.0 }
 0x10d   :  { %v595_v35 = vpop.eup %594  ;;  %v387_v40 = vsel %vm276_vm4, %v593_v23, 0.0 }
 0x10e   :  { %v382_v24 = vadd.f32 %v381_v22, %v380_v19  ;;  %v597_v41 = vpop.eup %596  ;;  %v389_v47 = vsel %vm276_vm4, %v595_v35, 0.0 }
 0x10f   :  { %v599_v21 = vpop.eup %598  ;;  %v391_v49 = vsel %vm276_vm4, %v597_v41, 0.0 }
 0x110   :  { %v384_v34 = vadd.f32 %v383_v28, %v382_v24  ;;  %v601_v53 = vpop.eup %600  ;;  %v393_v56 = vsel %vm276_vm4, %v599_v21, 0.0 }
 0x111   :  { %v603_v45 = vpop.eup %602  ;;  %v395_v57 = vsel %vm276_vm4, %v601_v53, 0.0 }
 0x112   :  { %v386_v36 = vadd.f32 %v385_v8, %v384_v34  ;;  %v605_v25 = vpop.eup %604  ;;  %v397_v61 = vsel %vm276_vm4, %v603_v45, 0.0 }
 0x113   :  { %v607_v58 = vpop.eup %606  ;;  %v399_v50 = vsel %vm276_vm4, %v605_v25, 0.0 }
 0x114   :  { %v388_v46 = vadd.f32 %v387_v40, %v386_v36  ;;  %v609_v59 = vpop.eup %608  ;;  %v401_v32 = vsel %vm276_vm4, %v607_v58, 0.0 }
 0x115   :  { %v403_v0 = vsel %vm276_vm4, %v609_v59, 0.0  ;;  %v611_v31 = vpop.eup %610 }
 0x116   :  { %v390_v48 = vadd.f32 %v389_v47, %v388_v46  ;;  %v319_v26 = vmul.f32 %v611_v31, %v318_v3 }
 0x118   :  { %v392_v55 = vadd.f32 %v391_v49, %v390_v48 }
 0x11a   :  { %v394_v29 = vadd.f32 %v393_v56, %v392_v55 }
 0x11c   :  { %v396_v37 = vadd.f32 %v395_v57, %v394_v29 }
 0x11e   :  { %v398_v30 = vadd.f32 %v397_v61, %v396_v37 }
 0x120   :  { %v400_v63 = vadd.f32 %v399_v50, %v398_v30 }
 0x122   :  { %v402_v39 = vadd.f32 %v401_v32, %v400_v63 }
 0x124   :  { %v404_v17 = vadd.f32 %v403_v0, %v402_v39 }
 0x126   :  { %v405_v60 = vrot.slane %v404_v17, 4 }
 0x128   :  { %v406_v1 = vadd.f32 %v405_v60, %v404_v17 }
 0x12a   :  { %v407_v7 = vrot.slane %v406_v1, 2 }
 0x12c   :  { %v408_v2 = vadd.f32 %v407_v7, %v406_v1 }
 0x12e   :  { %v409_v52 = vrot.slane %v408_v2, 1 }
 0x130   :  { %v410_v4 = vadd.f32 %v409_v52, %v408_v2 }
 0x132   :  { %v411_v5 = vadd.f32 %v410_v4, %v319_v26 }
 0x134   :  { %413 = vst.msk [vmem:[#allocation3] sm:$0x1] %vm18_vm1, %v411_v5 }
 0x13b   :  { %v496_v6 = vld [vmem:[#allocation3] sm:$0x1] }
 0x13c   :  { %612 = vlog2.f32 %v496_v6 }
 0x149   :  { %v613_v44 = vpop.eup %612 }
 0x14a   :  { %v498_v9 = vmul.f32 0.6931472, %v613_v44 }
 0x14c   :  { %v499_v38 = vadd.f32 %v498_v9, %v495_v10 }
 0x14e   :  { %v501_v11 = vsub.f32 %v499_v38, %v500_v43 }
 0x150   :  { %502 = vst.msk [vmem:[%s952_s3] sm:$0x1] %vm18_vm1, %v501_v11 }

</bundles_post_ra>
